<compile_context>
chip_gen: v7x
topology: tpu7x:2x2x1
jax: 0.10.0
libtpu: 0.0.40
codegen_flags: <defaults>
</compile_context>

<pallas_src>
import jax
import jax.numpy as jnp
from jax.experimental import pallas as pl
from jax.experimental.pallas import tpu as pltpu


def fpn_head_kernel(x_ref, w_ref, o_ref):
    """One row tile per grid step.

    x_ref : (TM, 3*W*Cin)     im2col-over-height activation rows (bf16)
    w_ref : (3*W*Cin, W*Cout) stacked banded weights (bf16), grid-invariant
    o_ref : (TM, W*Cout)      lane-dense output rows (f32)
    """
    acc = jnp.dot(x_ref[...], w_ref[...], preferred_element_type=jnp.float32)
    # ReLU + cast in f32 on the VPU (v5e-safe), one unmasked lane-dense store.
    o_ref[...] = jnp.maximum(acc, 0.0).astype(o_ref.dtype)


def _banded_weights(w_oihw, W):
    """Expand OIHW 3x3 weights into a stacked banded (3*W*Cin, W*Cout) matrix.

    wm[kh*W*Cin + wi*Cin + ci, wo*Cout + co] = w[co, ci, kh, wi-wo+1]
    when 0 <= wi-wo+1 < KW, else 0.  The out-of-band zeros implement the
    conv's width padding.
    """
    Cout, Cin, KH, KW = w_oihw.shape
    w_hwio = jnp.transpose(w_oihw, (2, 3, 1, 0))                # (KH,KW,Cin,Cout)
    wi = jnp.arange(W)[:, None]
    wo = jnp.arange(W)[None, :]
    kw = wi - wo + 1                                            # (W, W)
    valid = (kw >= 0) & (kw < KW)
    band = jnp.where(valid[None, :, :, None, None],
                     w_hwio[:, jnp.clip(kw, 0, KW - 1), :, :],
                     0.0)                                       # (KH,W,W,Cin,Cout)
    band = jnp.transpose(band, (0, 1, 3, 2, 4))                 # (KH,W,Cin,W,Cout)
    return band.reshape(KH * W * Cin, W * Cout)


def _pick_tile_m(m):
    # Largest tile (multiple of 16 for bf16 sublane packing) that divides M;
    # fall back to the full axis (exempt from the (8,128) rule).
    for cand in (512, 256, 128, 64, 32, 16):
        if m % cand == 0:
            return cand
    return m


def fpn_head_forward(x_nchw, w_oihw, *, compute_dtype=jnp.bfloat16):
    """FPNHead.forward: relu(conv3x3(x, w, padding=1, bias=None)), NCHW in/out."""
    N, Cin, H, W = x_nchw.shape
    Cout, _, KH, _ = w_oihw.shape

    # NCHW -> packed (N, H, W*Cin); pad only the 2-row height halo; then
    # im2col over height so each output row carries its 3 vertical taps
    # concatenated along the lane axis (K = 3*W*Cin).
    xp = jnp.transpose(x_nchw, (0, 2, 3, 1)).reshape(N, H, W * Cin)
    xp = jnp.pad(xp, ((0, 0), (1, 1), (0, 0)))                  # (N, H+2, W*Cin)
    xcol = jnp.concatenate([xp[:, kh:kh + H] for kh in range(KH)], axis=-1)
    xcol = xcol.reshape(N * H, KH * W * Cin).astype(compute_dtype)

    wm = _banded_weights(w_oihw, W).astype(compute_dtype)       # (3*W*Cin, W*Cout)

    M = N * H
    tm = _pick_tile_m(M)

    out_packed = pl.pallas_call(
        fpn_head_kernel,
        out_shape=jax.ShapeDtypeStruct((M, W * Cout), x_nchw.dtype),
        grid_spec=pl.GridSpec(
            grid=(M // tm,),
            in_specs=[
                # Distinct row tile per grid step (independent work per core).
                pl.BlockSpec((tm, KH * W * Cin), lambda i: (i, 0)),
                # Grid-invariant weights: same block every step, stays in VMEM.
                pl.BlockSpec((KH * W * Cin, W * Cout), lambda i: (0, 0)),
            ],
            out_specs=pl.BlockSpec((tm, W * Cout), lambda i: (i, 0)),
        ),
        compiler_params=pltpu.CompilerParams(
            dimension_semantics=("parallel",),
            vmem_limit_bytes=32 * 1024 * 1024),
    )(xcol, wm)

    # (N*H, W*Cout) -> NCHW to match the PyTorch module's output convention.
    out = out_packed.reshape(N, H, W, Cout)
    return jnp.transpose(out, (0, 3, 1, 2))


if __name__ == "__main__":
    # FPNHead(num_in=4, num_out=8), input x: (N=2, C=4, H=16, W=16)
    num_in, num_out = 4, 8
    N, H, W = 2, 16, 16

    key = jax.random.PRNGKey(0)
    kx, kw = jax.random.split(key)
    x = jax.random.normal(kx, (N, num_in, H, W), dtype=jnp.float32)
    # Conv2d weight shape (num_out, num_in, 3, 3); deterministic synthetic init.
    w = jax.random.normal(kw, (num_out, num_in, 3, 3), dtype=jnp.float32) * 0.1

    out = jax.jit(fpn_head_forward)(x, w)
    out = jax.block_until_ready(out)

    # Reference check against XLA's f32 conv (NCHW / OIHW, pad=1) + relu.
    # Tolerance is loosened for the bf16 MXU operands (f32 accumulation).
    ref = jax.lax.conv_general_dilated(
        x, w, window_strides=(1, 1), padding=((1, 1), (1, 1)),
        dimension_numbers=("NCHW", "OIHW", "NCHW"))
    ref = jnp.maximum(ref, 0.0)
    assert out.shape == (N, num_out, H, W)
    assert jnp.allclose(out, ref, atol=2e-2, rtol=2e-2), \
        float(jnp.max(jnp.abs(out - ref)))

    print("KERNEL_OK")
</pallas_src>

<mosaic_0001>
module attributes {stable_mosaic.version = 11 : i64} {
  func.func @fpn_head_kernel(%arg0: i32, %arg1: memref<32x192xbf16, #tpu.memory_space<vmem>>, %arg2: memref<192x128xbf16, #tpu.memory_space<vmem>>, %arg3: memref<32x128xf32, #tpu.memory_space<vmem>>) attributes {dimension_semantics = [#tpu.dimension_semantics<parallel>], iteration_bounds = array<i64: 1>, scalar_prefetch = 0 : i64, scratch_operands = 0 : i64, tpu.core_type = #tpu.core_type<tc>, window_params = [{transform_indices = @transform_0, window_bounds = array<i64: 32, 192>}, {pipeline_mode = #tpu.pipeline_mode<synchronous>, transform_indices = @transform_1, window_bounds = array<i64: 192, 128>}, {transform_indices = @transform_2, window_bounds = array<i64: 32, 128>}]} {
    %c0 = arith.constant 0 : index
    %c0_0 = arith.constant 0 : index
    %0 = vector.load %arg1[%c0, %c0_0] : memref<32x192xbf16, #tpu.memory_space<vmem>>, vector<32x192xbf16>
    %c0_1 = arith.constant 0 : index
    %c0_2 = arith.constant 0 : index
    %1 = vector.load %arg2[%c0_1, %c0_2] : memref<192x128xbf16, #tpu.memory_space<vmem>>, vector<192x128xbf16>
    %cst = arith.constant dense<0.000000e+00> : vector<32x128xf32>
    %2 = tpu.matmul %0, %1, %cst {dimension_numbers = #tpu.dot_dimension_numbers<[1], [0], [0], [1], [0, 0, 1, 1], [], []>} : vector<32x192xbf16>, vector<192x128xbf16>, vector<32x128xf32> -> vector<32x128xf32>
    %cst_3 = arith.constant 0.000000e+00 : f32
    %3 = vector.broadcast %cst_3 : f32 to vector<32x128xf32>
    %4 = arith.maximumf %2, %3 : vector<32x128xf32>
    %c0_4 = arith.constant 0 : index
    %c0_5 = arith.constant 0 : index
    %5 = vector.load %arg3[%c0_4, %c0_5] : memref<32x128xf32, #tpu.memory_space<vmem>>, vector<32x128xf32>
    tpu.vector_store %arg3[%c0_4, %c0_5], %4 {strides = array<i32>} : memref<32x128xf32, #tpu.memory_space<vmem>>, vector<32x128xf32>,
    return
  }
  func.func @transform_0(%arg0: i32) -> (i32, i32) {
    %c0_i32 = arith.constant 0 : i32
    %c0_i32_0 = arith.constant 0 : i32
    return %arg0, %c0_i32 : i32, i32
  }
  func.func @transform_1(%arg0: i32) -> (i32, i32) {
    %c0_i32 = arith.constant 0 : i32
    %c0_i32_0 = arith.constant 0 : i32
    %c0_i32_1 = arith.constant 0 : i32
    return %c0_i32, %c0_i32_0 : i32, i32
  }
  func.func @transform_2(%arg0: i32) -> (i32, i32) {
    %c0_i32 = arith.constant 0 : i32
    %c0_i32_0 = arith.constant 0 : i32
    return %arg0, %c0_i32 : i32, i32
  }
}

</mosaic_0001>

<bundles_post_ra>
// kernel: fpn_head_forward.1
= control target key start
LH: loop header
LB: loop body
LE: loop exit
PB: predicated region body
PF: predicated region fallthrough
CT: control target
= control target key end

     0   :  { %v259_v0 = vmov 0   ;;  %vm130_vm0 = vcmask 523264   ;;  %s359_s1 = inlined_call_operand.vmem [shape: bf16[192,128], index: 1, kind: input, shape index: {}]   ;;  %s360_s0 = inlined_call_operand.vmem [shape: bf16[32,192], index: 0, kind: input, shape index: {}]   ;;  %s361_s2 = inlined_call_operand.vmem [shape: f32[32,128], index: 2, kind: output, shape index: {}]  }
   0x1   :  { %137 = vmatprep.subr.bf16.mxu0 %v259_v0  ;;  %216 = vmatprep.subr.bf16.mxu1 %v259_v0  ;;  %v241_v1 = vld [vmem:[%s359_s1] sm:$0xff]   ;;  %v242_v2 = vld [vmem:[%s359_s1 + $0x8] sm:$0xff]   ;;  %v243_v3 = vld [vmem:[%s359_s1 + $0x10] sm:$0xff]  }
   0x2   :  { %138 = vmatpush1.bf16.msra.mxu0 %v241_v1  ;;  %228 = vmatpush1.bf16.msra.mxu1 %v241_v1  ;;  %v244_v4 = vld [vmem:[%s359_s1 + $0x18] sm:$0xff]   ;;  %v255_v5 = vld [vmem:[%s360_s0 + $0x4] ss:$8 sps:$4 sm:$0xff]   ;;  %v247_v9 = vld [vmem:[%s359_s1 + $0x30] sm:$0xff]  }
   0x3   :  { %139 = vmatprep.subr.bf16.mxu0 %v259_v0  ;;  %217 = vmatprep.subr.bf16.mxu1 %v259_v0  ;;  %v245_v6 = vld [vmem:[%s359_s1 + $0x20] sm:$0xff]   ;;  %v258_v7 = vld [vmem:[%s360_s0 + $0x14] ss:$8 sps:$4 sm:$0xff]   ;;  %v246_v8 = vld [vmem:[%s359_s1 + $0x28] sm:$0xff]  }
   0x4   :  { %214 = vmatprep.mubr.msk.bf16.mxu0 %vm130_vm0, %v255_v5  ;;  %215 = vmatprep.mubr.msk.bf16.mxu1 %vm130_vm0, %v258_v7  ;;  %v248_v10 = vld [vmem:[%s359_s1 + $0x38] sm:$0xff]   ;;  %v249_v11 = vld [vmem:[%s359_s1 + $0x40] sm:$0xff]   ;;  %v250_v12 = vld [vmem:[%s359_s1 + $0x48] sm:$0xff]  }
   0x5   :  { %v251_v13 = vld [vmem:[%s359_s1 + $0x50] sm:$0xff]   ;;  %v252_v14 = vld [vmem:[%s359_s1 + $0x58] sm:$0xff]   ;;  %v253_v15 = vld [vmem:[%s360_s0] ss:$8 sps:$4 sm:$0xff]  }
   0x6   :  { %140 = vmatpush1.bf16.msra.mxu0 %v242_v2  ;;  %229 = vmatpush1.bf16.msra.mxu1 %v242_v2  ;;  %v256_v16 = vld [vmem:[%s360_s0 + $0x10] ss:$8 sps:$4 sm:$0xff]  }
   0x7   :  { %141 = vmatprep.subr.bf16.mxu0 %v259_v0  ;;  %218 = vmatprep.subr.bf16.mxu1 %v259_v0 }
   0xa   :  { %142 = vmatpush1.bf16.msra.mxu0 %v243_v3  ;;  %230 = vmatpush1.bf16.msra.mxu1 %v243_v3 }
   0xb   :  { %143 = vmatprep.subr.bf16.mxu0 %v259_v0  ;;  %219 = vmatprep.subr.bf16.mxu1 %v259_v0 }
   0xe   :  { %144 = vmatpush1.bf16.msra.mxu0 %v244_v4  ;;  %231 = vmatpush1.bf16.msra.mxu1 %v244_v4 }
   0xf   :  { %145 = vmatprep.subr.bf16.mxu0 %v259_v0  ;;  %220 = vmatprep.subr.bf16.mxu1 %v259_v0 }
  0x12   :  { %146 = vmatpush1.bf16.msra.mxu0 %v245_v6  ;;  %232 = vmatpush1.bf16.msra.mxu1 %v245_v6 }
  0x13   :  { %147 = vmatprep.subr.bf16.mxu0 %v259_v0  ;;  %221 = vmatprep.subr.bf16.mxu1 %v259_v0 }
  0x16   :  { %148 = vmatpush1.bf16.msra.mxu0 %v246_v8  ;;  %233 = vmatpush1.bf16.msra.mxu1 %v246_v8 }
  0x17   :  { %149 = vmatprep.subr.bf16.mxu0 %v259_v0  ;;  %222 = vmatprep.subr.bf16.mxu1 %v259_v0 }
  0x1a   :  { %150 = vmatpush1.bf16.msra.mxu0 %v247_v9  ;;  %234 = vmatpush1.bf16.msra.mxu1 %v247_v9 }
  0x1b   :  { %151 = vmatprep.subr.bf16.mxu0 %v259_v0  ;;  %223 = vmatprep.subr.bf16.mxu1 %v259_v0 }
  0x1e   :  { %152 = vmatpush1.bf16.msra.mxu0 %v248_v10  ;;  %235 = vmatpush1.bf16.msra.mxu1 %v248_v10 }
  0x1f   :  { %153 = vmatprep.subr.bf16.mxu0 %v259_v0  ;;  %224 = vmatprep.subr.bf16.mxu1 %v259_v0 }
  0x22   :  { %154 = vmatpush1.bf16.msra.mxu0 %v249_v11  ;;  %236 = vmatpush1.bf16.msra.mxu1 %v249_v11 }
  0x23   :  { %155 = vmatprep.subr.bf16.mxu0 %v259_v0  ;;  %225 = vmatprep.subr.bf16.mxu1 %v259_v0 }
  0x26   :  { %156 = vmatpush1.bf16.msra.mxu0 %v250_v12  ;;  %237 = vmatpush1.bf16.msra.mxu1 %v250_v12 }
  0x27   :  { %157 = vmatprep.subr.bf16.mxu0 %v259_v0  ;;  %226 = vmatprep.subr.bf16.mxu1 %v259_v0 }
  0x2a   :  { %158 = vmatpush1.bf16.msra.mxu0 %v251_v13  ;;  %238 = vmatpush1.bf16.msra.mxu1 %v251_v13 }
  0x2b   :  { %159 = vmatprep.subr.bf16.mxu0 %v259_v0  ;;  %227 = vmatprep.subr.bf16.mxu1 %v259_v0 }
  0x2e   :  { %160 = vmatpush1.bf16.msra.mxu0 %v252_v14  ;;  %239 = vmatpush1.bf16.msra.mxu1 %v252_v14 }
  0x31   :  { %170 = vmatmul.mubr.bf16.vlgmr.msra.gmra.mrb[0].mxu0 %v253_v15  ;;  %178 = vmatmul.mubr.bf16.vlgmr.msra.gmra.mrb[0].mxu1 %v256_v16 }
 0x104   :  { %v171_v17 = vpop.f32.mrb[0].mxu0  ;;  %v179_v18 = vpop.f32.mrb[0].mxu1 }
 0x105   :  { %v186_v19 = vmax.f32 %v171_v17, 0.0  ;;  %v188_v20 = vmax.f32 %v179_v18, 0.0  ;;  %v173_v21 = vpop.f32.mrb[1].mxu0  ;;  %v181_v22 = vpop.f32.mrb[1].mxu1 }
 0x106   :  { %v174_v23 = vpop.f32.mrb[2].mxu0  ;;  %v182_v24 = vpop.f32.mrb[2].mxu1 }
 0x107   :  { %190 = vst [vmem:[%s361_s2] sm:$0xff] %v186_v19  ;;  %192 = vst [vmem:[%s361_s2 + $0x10] sm:$0xff] %v188_v20  ;;  %v187_v25 = vmax.f32 %v174_v23, 0.0  ;;  %v189_v26 = vmax.f32 %v182_v24, 0.0  ;;  %v176_v27 = vpop.f32.mrb[3].mxu0  ;;  %v184_v28 = vpop.f32.mrb[3].mxu1 }
 0x109   :  { %191 = vst [vmem:[%s361_s2 + $0x8] sm:$0xff] %v187_v25  ;;  %193 = vst [vmem:[%s361_s2 + $0x18] sm:$0xff] %v189_v26 }

</bundles_post_ra>
